<compile_context>
chip_gen: v5e
topology: v5e:2x2
jax: 0.10.0
libtpu: 0.0.40
codegen_flags: <defaults>
</compile_context>

<pallas_src>
import functools

import jax
import jax.numpy as jnp
from jax.experimental import pallas as pl
from jax.experimental.pallas import tpu as pltpu


def _round_up(x: int, m: int) -> int:
    return ((x + m - 1) // m) * m


def _pick_batch_tile(b: int) -> int:
    """Batch tile.

    Small batches run as one full-batch step.  Larger batches split into >=2
    grid steps (sharded across TensorCores on v7x via the "parallel" semantic);
    split tiles are multiples of 128 so the narrow output block stays aligned,
    and are capped at 2048 rows so f32 intermediates stay well inside even
    v5e's 16 MiB scoped-VMEM default.
    """
    if b <= 512:
        return b
    for t in (2048, 1024, 512, 256, 128):
        if b % t == 0 and b // t >= 2:
            return t
    return b  # awkward batch size: one full-batch step (still correct)


def actor_critic_kernel(s_ref, w1_ref, wp_ref, bp_ref, out_ref, *, p, out_w):
    """Fused MLP trunk + (actor | critic) heads in 4 MXU dots.

    s_ref   : [TB, S]    bf16 states (no padding needed)
    w1_ref  : [S, p]     bf16 trunk layer-1 weight
    wp_ref  : [3p, p]    bf16 packed weights: w2 / [wa1|wc1] / blockdiag(wa2,wc2)
    bp_ref  : [8, p]     f32 packed biases (rows 0..3 used)
    out_ref : [TB, out_w] f32: lanes 0..A-1 = logits, lane A = value, rest 0
    """
    x = s_ref[...]

    # feature trunk: Linear -> ReLU -> Linear -> ReLU (f32 accumulate, bf16 feed)
    h = jnp.dot(x, w1_ref[...], preferred_element_type=jnp.float32) + bp_ref[0:1, :]
    h = jnp.maximum(h, 0.0).astype(jnp.bfloat16)
    h = jnp.dot(h, wp_ref[0:p, :], preferred_element_type=jnp.float32) + bp_ref[1:2, :]
    h = jnp.maximum(h, 0.0).astype(jnp.bfloat16)

    # fused head layer 1: [wa1 | wc1] side by side in lanes, shared ReLU
    y = jnp.dot(h, wp_ref[p:2 * p, :], preferred_element_type=jnp.float32) + bp_ref[2:3, :]
    y = jnp.maximum(y, 0.0).astype(jnp.bfloat16)

    # fused head layer 2: block-diag(wa2, wc2) -> lanes [logits | value | zeros]
    out = jnp.dot(y, wp_ref[2 * p:3 * p, :], preferred_element_type=jnp.float32) + bp_ref[3:4, :]

    # Narrow writeback: only the first out_w lanes (logits + value) leave VMEM.
    out_ref[...] = out[:, 0:out_w].astype(out_ref.dtype)


def pack_params(params, state_dim):
    """Pack the 12 weight/bias arrays into 3 slabs (bf16 weights, f32 biases)."""
    H = params["w1"].shape[1]
    A = params["wa2"].shape[1]
    half = H // 2
    S = state_dim
    p = _round_up(max(H, A + 1, 128), 128)
    out_w = _round_up(A + 1, 8)

    def pad_to(a, rows, cols):
        return jnp.pad(a, ((0, rows - a.shape[0]), (0, cols - a.shape[1])))

    # Layer-1 weight kept at its natural (S, p) shape -> no state padding needed.
    w1p = pad_to(params["w1"], S, p).astype(jnp.bfloat16)

    w2p = pad_to(params["w2"], p, p)

    # fused head layer-1 weight: [wa1 | wc1] -> (H, 2*half)
    wh1 = jnp.concatenate([params["wa1"], params["wc1"]], axis=1)
    wh1p = pad_to(wh1, p, p)

    # fused head layer-2 weight: block-diagonal (2*half, A+1)
    wh2 = jnp.zeros((2 * half, A + 1), jnp.float32)
    wh2 = wh2.at[:half, :A].set(params["wa2"])
    wh2 = wh2.at[half:, A:].set(params["wc2"])
    wh2p = pad_to(wh2, p, p)

    wp = jnp.concatenate([w2p, wh1p, wh2p], axis=0).astype(jnp.bfloat16)  # [3p, p]

    bp = jnp.zeros((8, p), jnp.float32)
    bp = bp.at[0, :H].set(params["b1"][0])
    bp = bp.at[1, :H].set(params["b2"][0])
    bp = bp.at[2, :2 * half].set(jnp.concatenate([params["ba1"], params["bc1"]], axis=1)[0])
    bp = bp.at[3, :A + 1].set(jnp.concatenate([params["ba2"], params["bc2"]], axis=1)[0])

    meta = dict(state_dim=S, p=p, out_w=out_w, action_dim=A, hidden=H)
    return w1p, wp, bp, meta


def actor_critic_forward(state, w1p, wp, bp, meta):
    """state: [B, state_dim]; w1p/wp/bp/meta from pack_params. Returns (logits, value)."""
    B, S = state.shape
    p = meta["p"]
    out_w = meta["out_w"]
    A = meta["action_dim"]

    # Rollout buffers should store bf16 states; the cast here is only a fallback.
    if state.dtype != jnp.bfloat16:
        state = state.astype(jnp.bfloat16)

    TB = _pick_batch_tile(B)
    grid = (B // TB,)

    kernel = functools.partial(actor_critic_kernel, p=p, out_w=out_w)

    flops = 2 * B * (S * p + 3 * p * p)
    bytes_accessed = B * S * 2 + (S + 3 * p) * p * 2 + 8 * p * 4 + B * out_w * 4

    out = pl.pallas_call(
        kernel,
        out_shape=jax.ShapeDtypeStruct((B, out_w), jnp.float32),
        grid_spec=pltpu.PrefetchScalarGridSpec(
            num_scalar_prefetch=0,
            grid=grid,
            in_specs=[
                pl.BlockSpec((TB, S), lambda i: (i, 0)),      # states: tiled over batch
                pl.BlockSpec((S, p), lambda i: (0, 0)),       # layer-1 weight: resident
                pl.BlockSpec((3 * p, p), lambda i: (0, 0)),   # packed deeper weights: resident
                pl.BlockSpec((8, p), lambda i: (0, 0)),       # packed biases: resident
            ],
            out_specs=pl.BlockSpec((TB, out_w), lambda i: (i, 0)),  # narrow output slab
        ),
        compiler_params=pltpu.CompilerParams(
            dimension_semantics=("parallel",),
            vmem_limit_bytes=32 * 1024 * 1024,
        ),
        cost_estimate=pl.CostEstimate(
            flops=flops, transcendentals=0, bytes_accessed=bytes_accessed),
    )(state, w1p, wp, bp)

    # Trivial slices of the tiny (B, out_w) slab.
    # TODO(synk): in a real PPO rollout, fuse softmax/sampling + value read into the
    # kernel epilogue so only actions / log-probs / values leave HBM.
    logits = out[:, :A]
    value = out[:, A:A + 1]
    return logits, value


def init_params(key, state_dim, action_dim, hidden_dim):
    """Deterministic synthetic init (PyTorch-style uniform fan-in scaling).

    Weights stored [in_features, out_features] (transposed vs. nn.Linear).
    """
    half = hidden_dim // 2

    def linear(key, fan_in, fan_out):
        kw, kb = jax.random.split(key)
        bound = 1.0 / jnp.sqrt(fan_in)
        w = jax.random.uniform(kw, (fan_in, fan_out), jnp.float32, -bound, bound)
        b = jax.random.uniform(kb, (1, fan_out), jnp.float32, -bound, bound)
        return w, b

    keys = jax.random.split(key, 6)
    w1, b1 = linear(keys[0], state_dim, hidden_dim)
    w2, b2 = linear(keys[1], hidden_dim, hidden_dim)
    wa1, ba1 = linear(keys[2], hidden_dim, half)
    wa2, ba2 = linear(keys[3], half, action_dim)
    wc1, bc1 = linear(keys[4], hidden_dim, half)
    wc2, bc2 = linear(keys[5], half, 1)
    return dict(w1=w1, b1=b1, w2=w2, b2=b2,
                wa1=wa1, ba1=ba1, wa2=wa2, ba2=ba2,
                wc1=wc1, bc1=bc1, wc2=wc2, bc2=bc2)


def reference_forward(state, p):
    """Pure-JAX reference (same math as the PyTorch module)."""
    h = jnp.maximum(state @ p["w1"] + p["b1"], 0.0)
    h = jnp.maximum(h @ p["w2"] + p["b2"], 0.0)
    a = jnp.maximum(h @ p["wa1"] + p["ba1"], 0.0)
    logits = a @ p["wa2"] + p["ba2"]
    c = jnp.maximum(h @ p["wc1"] + p["bc1"], 0.0)
    value = c @ p["wc2"] + p["bc2"]
    return logits, value


if __name__ == "__main__":
    state_dim, action_dim, hidden_dim = 16, 4, 32
    batch = 8

    key = jax.random.PRNGKey(0)
    k_params, k_state = jax.random.split(key)
    params = init_params(k_params, state_dim, action_dim, hidden_dim)
    state = jax.random.normal(k_state, (batch, state_dim), jnp.float32)

    # Pack once (model-build time in a real PPO loop); weight slabs go to bf16.
    w1p, wp, bp, meta = pack_params(params, state_dim)

    fwd = jax.jit(functools.partial(actor_critic_forward, meta=meta))
    logits, value = fwd(state, w1p, wp, bp)
    jax.block_until_ready((logits, value))

    # Reference using the same bf16 quantization of weights/states the kernel sees.
    q = {k: (v.astype(jnp.bfloat16).astype(jnp.float32) if k.startswith("w") else v)
         for k, v in params.items()}
    state_q = state.astype(jnp.bfloat16).astype(jnp.float32)
    ref_logits, ref_value = reference_forward(state_q, q)

    assert logits.shape == (batch, action_dim)
    assert value.shape == (batch, 1)
    assert jnp.allclose(logits, ref_logits, atol=2e-2, rtol=2e-2)
    assert jnp.allclose(value, ref_value, atol=2e-2, rtol=2e-2)

    print("KERNEL_OK")
</pallas_src>

<mosaic_0001>
module attributes {stable_mosaic.version = 11 : i64} {
  func.func @actor_critic_kernel(%arg0: i32, %arg1: memref<8x16xbf16, #tpu.memory_space<vmem>>, %arg2: memref<16x128xbf16, #tpu.memory_space<vmem>>, %arg3: memref<384x128xbf16, #tpu.memory_space<vmem>>, %arg4: memref<8x128xf32, #tpu.memory_space<vmem>>, %arg5: memref<8x8xf32, #tpu.memory_space<vmem>>) attributes {dimension_semantics = [#tpu.dimension_semantics<parallel>], iteration_bounds = array<i64: 1>, scalar_prefetch = 0 : i64, scratch_operands = 0 : i64, tpu.core_type = #tpu.core_type<tc>, window_params = [{transform_indices = @transform_0, window_bounds = array<i64: 8, 16>}, {pipeline_mode = #tpu.pipeline_mode<synchronous>, transform_indices = @transform_1, window_bounds = array<i64: 16, 128>}, {pipeline_mode = #tpu.pipeline_mode<synchronous>, transform_indices = @transform_2, window_bounds = array<i64: 384, 128>}, {pipeline_mode = #tpu.pipeline_mode<synchronous>, transform_indices = @transform_3, window_bounds = array<i64: 8, 128>}, {transform_indices = @transform_4, window_bounds = array<i64: 8, 8>}]} {
    %c0 = arith.constant 0 : index
    %c0_0 = arith.constant 0 : index
    %0 = vector.load %arg1[%c0, %c0_0] : memref<8x16xbf16, #tpu.memory_space<vmem>>, vector<8x16xbf16>
    %c0_1 = arith.constant 0 : index
    %c0_2 = arith.constant 0 : index
    %1 = vector.load %arg2[%c0_1, %c0_2] : memref<16x128xbf16, #tpu.memory_space<vmem>>, vector<16x128xbf16>
    %cst = arith.constant dense<0.000000e+00> : vector<8x128xf32>
    %2 = tpu.matmul %0, %1, %cst {dimension_numbers = #tpu.dot_dimension_numbers<[1], [0], [0], [1], [0, 0, 1, 1], [], []>} : vector<8x16xbf16>, vector<16x128xbf16>, vector<8x128xf32> -> vector<8x128xf32>
    %c0_3 = arith.constant 0 : index
    %c0_4 = arith.constant 0 : index
    %3 = vector.load %arg4[%c0_3, %c0_4] : memref<8x128xf32, #tpu.memory_space<vmem>>, vector<1x128xf32>
    %4 = vector.broadcast %3 : vector<1x128xf32> to vector<8x128xf32>
    %5 = arith.addf %2, %4 : vector<8x128xf32>
    %cst_5 = arith.constant 0.000000e+00 : f32
    %6 = vector.broadcast %cst_5 : f32 to vector<8x128xf32>
    %7 = arith.maximumf %5, %6 : vector<8x128xf32>
    %8 = arith.truncf %7 : vector<8x128xf32> to vector<8x128xbf16>
    %c0_6 = arith.constant 0 : index
    %c0_7 = arith.constant 0 : index
    %9 = vector.load %arg3[%c0_6, %c0_7] : memref<384x128xbf16, #tpu.memory_space<vmem>>, vector<128x128xbf16>
    %cst_8 = arith.constant dense<0.000000e+00> : vector<8x128xf32>
    %10 = tpu.matmul %8, %9, %cst_8 {dimension_numbers = #tpu.dot_dimension_numbers<[1], [0], [0], [1], [0, 0, 1, 1], [], []>} : vector<8x128xbf16>, vector<128x128xbf16>, vector<8x128xf32> -> vector<8x128xf32>
    %c1 = arith.constant 1 : index
    %c0_9 = arith.constant 0 : index
    %11 = vector.load %arg4[%c1, %c0_9] : memref<8x128xf32, #tpu.memory_space<vmem>>, vector<1x128xf32>
    %12 = vector.broadcast %11 : vector<1x128xf32> to vector<8x128xf32>
    %13 = arith.addf %10, %12 : vector<8x128xf32>
    %cst_10 = arith.constant 0.000000e+00 : f32
    %14 = vector.broadcast %cst_10 : f32 to vector<8x128xf32>
    %15 = arith.maximumf %13, %14 : vector<8x128xf32>
    %16 = arith.truncf %15 : vector<8x128xf32> to vector<8x128xbf16>
    %c128 = arith.constant 128 : index
    %c0_11 = arith.constant 0 : index
    %17 = vector.load %arg3[%c128, %c0_11] : memref<384x128xbf16, #tpu.memory_space<vmem>>, vector<128x128xbf16>
    %cst_12 = arith.constant dense<0.000000e+00> : vector<8x128xf32>
    %18 = tpu.matmul %16, %17, %cst_12 {dimension_numbers = #tpu.dot_dimension_numbers<[1], [0], [0], [1], [0, 0, 1, 1], [], []>} : vector<8x128xbf16>, vector<128x128xbf16>, vector<8x128xf32> -> vector<8x128xf32>
    %c2 = arith.constant 2 : index
    %c0_13 = arith.constant 0 : index
    %19 = vector.load %arg4[%c2, %c0_13] : memref<8x128xf32, #tpu.memory_space<vmem>>, vector<1x128xf32>
    %20 = vector.broadcast %19 : vector<1x128xf32> to vector<8x128xf32>
    %21 = arith.addf %18, %20 : vector<8x128xf32>
    %cst_14 = arith.constant 0.000000e+00 : f32
    %22 = vector.broadcast %cst_14 : f32 to vector<8x128xf32>
    %23 = arith.maximumf %21, %22 : vector<8x128xf32>
    %24 = arith.truncf %23 : vector<8x128xf32> to vector<8x128xbf16>
    %c256 = arith.constant 256 : index
    %c0_15 = arith.constant 0 : index
    %25 = vector.load %arg3[%c256, %c0_15] : memref<384x128xbf16, #tpu.memory_space<vmem>>, vector<128x128xbf16>
    %cst_16 = arith.constant dense<0.000000e+00> : vector<8x128xf32>
    %26 = tpu.matmul %24, %25, %cst_16 {dimension_numbers = #tpu.dot_dimension_numbers<[1], [0], [0], [1], [0, 0, 1, 1], [], []>} : vector<8x128xbf16>, vector<128x128xbf16>, vector<8x128xf32> -> vector<8x128xf32>
    %c3 = arith.constant 3 : index
    %c0_17 = arith.constant 0 : index
    %27 = vector.load %arg4[%c3, %c0_17] : memref<8x128xf32, #tpu.memory_space<vmem>>, vector<1x128xf32>
    %28 = vector.broadcast %27 : vector<1x128xf32> to vector<8x128xf32>
    %29 = arith.addf %26, %28 : vector<8x128xf32>
    %30 = vector.extract_strided_slice %29 {offsets = [0, 0], sizes = [8, 8], strides = [1, 1]} : vector<8x128xf32> to vector<8x8xf32>
    %c0_18 = arith.constant 0 : index
    %c0_19 = arith.constant 0 : index
    %31 = vector.load %arg5[%c0_18, %c0_19] : memref<8x8xf32, #tpu.memory_space<vmem>>, vector<8x8xf32>
    tpu.vector_store %arg5[%c0_18, %c0_19], %30 {strides = array<i32>} : memref<8x8xf32, #tpu.memory_space<vmem>>, vector<8x8xf32>,
    return
  }
  func.func @transform_0(%arg0: i32) -> (i32, i32) {
    %c0_i32 = arith.constant 0 : i32
    %c0_i32_0 = arith.constant 0 : i32
    return %arg0, %c0_i32 : i32, i32
  }
  func.func @transform_1(%arg0: i32) -> (i32, i32) {
    %c0_i32 = arith.constant 0 : i32
    %c0_i32_0 = arith.constant 0 : i32
    %c0_i32_1 = arith.constant 0 : i32
    return %c0_i32, %c0_i32_0 : i32, i32
  }
  func.func @transform_2(%arg0: i32) -> (i32, i32) {
    %c0_i32 = arith.constant 0 : i32
    %c0_i32_0 = arith.constant 0 : i32
    %c0_i32_1 = arith.constant 0 : i32
    return %c0_i32, %c0_i32_0 : i32, i32
  }
  func.func @transform_3(%arg0: i32) -> (i32, i32) {
    %c0_i32 = arith.constant 0 : i32
    %c0_i32_0 = arith.constant 0 : i32
    %c0_i32_1 = arith.constant 0 : i32
    return %c0_i32, %c0_i32_0 : i32, i32
  }
  func.func @transform_4(%arg0: i32) -> (i32, i32) {
    %c0_i32 = arith.constant 0 : i32
    %c0_i32_0 = arith.constant 0 : i32
    return %arg0, %c0_i32 : i32, i32
  }
}

</mosaic_0001>

<bundles_post_ra>
// kernel: actor_critic_forward.1
= control target key start
LH: loop header
LB: loop body
LE: loop exit
PB: predicated region body
PF: predicated region fallthrough
CT: control target
= control target key end

     0   :  { %9 = vsyncpa [#allocation3], 0  ;;  %s557_s0 = inlined_call_operand.vmem [shape: bf16[8,16], index: 0, kind: input, shape index: {}]   ;;  %s558_s1 = inlined_call_operand.vmem [shape: bf16[16,128], index: 1, kind: input, shape index: {}]   ;;  %s559_s2 = inlined_call_operand.hbm [shape: bf16[384,128], index: 2, kind: input, shape index: {}]   ;;  %s560_s3 = inlined_call_operand.hbm [shape: f32[8,128], index: 3, kind: input, shape index: {}]   ;;  %s561_s4 = inlined_call_operand.vmem [shape: f32[8,8], index: 4, kind: output, shape index: {}]  }
   0x1   :  { %s19_s17 = sshll.u32 %s559_s2, 4  ;;  %s20_s17 = int_to_ptr.hbm [resolvable:$true] %s19_s17 }
   0x2   :  { %10 = vsyncpa [#allocation5], 0  ;;  %s513_s18 = smov [#allocation2]   ;;  %s33_s22 = sshll.u32 %s560_s3, 4  ;;  %s34_s22 = int_to_ptr.hbm [resolvable:$true] %s33_s22 }
   0x3   :  { %s21_s19 = sshll.u32 %s513_s18, 4  ;;  %s514_s23 = smov 64   ;;  %s22_s19 = int_to_ptr.vmem [resolvable:$true] %s21_s19 }
   0x4   :  { %s515_s24 = smov 4   ;;  %s516_s25 = smov [#allocation4]  }
   0x5   :  { %27 = dma.hbm_to_vmem [thread:$0]  %s20_s17, 3072, %s22_s19, [#allocation3], %s514_s23, %s514_s23, %s515_s24  }
   0x6   :  { %s35_s26 = sshll.u32 %s516_s25, 4  ;;  %s36_s26 = int_to_ptr.vmem [resolvable:$true] %s35_s26 }
   0x7   :  { %38 = dma.hbm_to_vmem [thread:$0]  %s34_s22, 128, %s36_s26, [#allocation5]  }
   0x8   :  { %509 = dma.done.wait [#allocation3], 3072  }
   0x9   :  { %510 = vsyncadd [#allocation3], 4294964224 }
   0xa   :  { %511 = dma.done.wait [#allocation5], 128  }
   0xb   :  { %512 = vsyncadd [#allocation5], 4294967168  ;;  %v428_v0 = vld [vmem:[%s558_s1] sm:$0xff]  ;;  %v436_v1 = vld [vmem:[#allocation2 + $0x38] sm:$0xff]  ;;  %vm59_vm0 = vcmask 130048   ;;  %vm319_vm1 = vcmask 64512  }
   0xc   :  { %70 = vmatpush.bf16.msra.mxu0 %v428_v0  ;;  %v48_v2 = vld [vmem:[%s557_s0] sm:$0xf]  ;;  %144 = vmatpush.bf16.msra.mxu1 %v436_v1  ;;  %v435_v3 = vld [vmem:[#allocation2 + $0x30] sm:$0xff]  ;;  %v434_v4 = vld [vmem:[#allocation2 + $0x28] sm:$0xff] }
   0xd   :  { %v433_v5 = vld [vmem:[#allocation2 + $0x20] sm:$0xff]  ;;  %v432_v6 = vld [vmem:[#allocation2 + $0x18] sm:$0xff]  ;;  %v431_v7 = vld [vmem:[#allocation2 + $0x10] sm:$0xff] }
   0xe   :  { %v430_v8 = vld [vmem:[#allocation2 + $0x8] sm:$0xff]  ;;  %v429_v9 = vld [vmem:[#allocation2] sm:$0xff]  ;;  %v444_v10 = vld [vmem:[#allocation2 + $0x78] sm:$0xff] }
   0xf   :  { %331 = vmatmul.msk.bf16.vlgmr.msra.gmra.mxu0 %vm59_vm0, %v48_v2  ;;  %225 = vmatpush.bf16.msra.mxu2 %v444_v10  ;;  %v443_v11 = vld [vmem:[#allocation2 + $0x70] sm:$0xff]  ;;  %v442_v12 = vld [vmem:[#allocation2 + $0x68] sm:$0xff]  ;;  %v441_v13 = vld [vmem:[#allocation2 + $0x60] sm:$0xff] }
  0x10   :  { %145 = vmatpush.bf16.msra.mxu1 %v435_v3  ;;  %v440_v14 = vld [vmem:[#allocation2 + $0x58] sm:$0xff]  ;;  %v439_v15 = vld [vmem:[#allocation2 + $0x50] sm:$0xff]  ;;  %v457_v16 = vld [vmem:[#allocation4] ss:$0 sm:$0xff] }
  0x11   :  { %v438_v22 = vld [vmem:[#allocation2 + $0x48] sm:$0xff]  ;;  %v437_v23 = vld [vmem:[#allocation2 + $0x40] sm:$0xff]  ;;  %v452_v24 = vld [vmem:[#allocation2 + $0xb8] sm:$0xff] }
  0x12   :  { %306 = vmatpush.bf16.msra.mxu3 %v452_v24  ;;  %v451_v25 = vld [vmem:[#allocation2 + $0xb0] sm:$0xff]  ;;  %v450_v26 = vld [vmem:[#allocation2 + $0xa8] sm:$0xff]  ;;  %v449_v27 = vld [vmem:[#allocation2 + $0xa0] sm:$0xff] }
  0x13   :  { %226 = vmatpush.bf16.msra.mxu2 %v443_v11  ;;  %v448_v28 = vld [vmem:[#allocation2 + $0x98] sm:$0xff]  ;;  %v447_v29 = vld [vmem:[#allocation2 + $0x90] sm:$0xff]  ;;  %v458_v30 = vld [vmem:[#allocation4 + $0x1] ss:$0 sm:$0xff] }
  0x14   :  { %146 = vmatpush.bf16.msra.mxu1 %v434_v4  ;;  %v446_v36 = vld [vmem:[#allocation2 + $0x88] sm:$0xff]  ;;  %v445_v37 = vld [vmem:[#allocation2 + $0x80] sm:$0xff] }
  0x15   :  { %v459_v38 = vld [vmem:[#allocation4 + $0x2] ss:$0 sm:$0xff]  ;;  %v460_v44 = vld [vmem:[#allocation4 + $0x3] ss:$0 sm:$0xff] }
  0x16   :  { %307 = vmatpush.bf16.msra.mxu3 %v451_v25 }
  0x17   :  { %227 = vmatpush.bf16.msra.mxu2 %v442_v12 }
  0x18   :  { %147 = vmatpush.bf16.msra.mxu1 %v433_v5 }
  0x1a   :  { %308 = vmatpush.bf16.msra.mxu3 %v450_v26 }
  0x1b   :  { %228 = vmatpush.bf16.msra.mxu2 %v441_v13 }
  0x1c   :  { %148 = vmatpush.bf16.msra.mxu1 %v432_v6 }
  0x1e   :  { %309 = vmatpush.bf16.msra.mxu3 %v449_v27 }
  0x1f   :  { %229 = vmatpush.bf16.msra.mxu2 %v440_v14 }
  0x20   :  { %149 = vmatpush.bf16.msra.mxu1 %v431_v7 }
  0x22   :  { %310 = vmatpush.bf16.msra.mxu3 %v448_v28 }
  0x23   :  { %230 = vmatpush.bf16.msra.mxu2 %v439_v15 }
  0x24   :  { %150 = vmatpush.bf16.msra.mxu1 %v430_v8 }
  0x26   :  { %311 = vmatpush.bf16.msra.mxu3 %v447_v29 }
  0x27   :  { %231 = vmatpush.bf16.msra.mxu2 %v438_v22 }
  0x28   :  { %151 = vmatpush.bf16.msra.mxu1 %v429_v9 }
  0x2a   :  { %312 = vmatpush.bf16.msra.mxu3 %v446_v36 }
  0x2b   :  { %232 = vmatpush.bf16.msra.mxu2 %v437_v23 }
  0x2e   :  { %313 = vmatpush.bf16.msra.mxu3 %v445_v37 }
  0x8c   :  { %v72_v17 = vpop.f32.mrf.mxu0 }
  0x8d   :  { %v73_v18 = vadd.f32 %v457_v16, %v72_v17 }
  0x8f   :  { %v76_v19 = vmax.f32 %v73_v18, 0.0 }
  0x91   :  { %v77_v20 = vpack.c.bf16 %v76_v19, %v76_v19 }
  0x93   :  { %152 = vmatmul.bf16.vlgmr.msra.gmra.mxu1 %v77_v20 }
  0x94   :  { %v74_v21 = vpop.f32.mrf.mxu0 }
 0x110   :  { %v153_v31 = vpop.f32.mrf.mxu1 }
 0x111   :  { %v154_v32 = vadd.f32 %v458_v30, %v153_v31 }
 0x113   :  { %v157_v33 = vmax.f32 %v154_v32, 0.0 }
 0x115   :  { %v158_v34 = vpack.c.bf16 %v157_v33, %v157_v33 }
 0x117   :  { %233 = vmatmul.bf16.vlgmr.msra.gmra.mxu2 %v158_v34 }
 0x118   :  { %v155_v35 = vpop.f32.mrf.mxu1 }
 0x19a   :  { %v234_v39 = vpop.f32.mrf.mxu2 }
 0x19b   :  { %v235_v40 = vadd.f32 %v459_v38, %v234_v39 }
 0x19d   :  { %v238_v41 = vmax.f32 %v235_v40, 0.0 }
 0x19f   :  { %v239_v42 = vpack.c.bf16 %v238_v41, %v238_v41 }
 0x1a1   :  { %314 = vmatmul.bf16.vlgmr.msra.gmra.mxu3 %v239_v42 }
 0x1a2   :  { %v236_v43 = vpop.f32.mrf.mxu2 }
 0x224   :  { %v315_v45 = vpop.f32.mrf.mxu3 }
 0x225   :  { %v316_v46 = vadd.f32 %v460_v44, %v315_v45 }
 0x227   :  { %320 = vst.msk [vmem:[%s561_s4] sm:$0xff] %vm319_vm1, %v316_v46 }
 0x22c   :  { %v317_v47 = vpop.f32.mrf.mxu3 }
 0x22d   :  { %325 = vsyncpa [#allocation3], 1 }
 0x22e   :  { %326 = vsyncpa [#allocation5], 1 }

</bundles_post_ra>
